<compile_context>
chip_gen: v7x
topology: tpu7x:2x2x1
jax: 0.10.0
libtpu: 0.0.40
codegen_flags: <defaults>
</compile_context>

<pallas_src>
import jax
import jax.numpy as jnp
from jax.experimental import pallas as pl
from jax.experimental.pallas import tpu as pltpu

LANE = 128
SUBLANE = 8


def _round_up(v, m):
    return ((v + m - 1) // m) * m


# ----------------------------- Pallas kernel -------------------------------

def fused_graphsage_kernel(a_ref, x_ref,
                           wl1_ref, wr1_ref, b1_ref,
                           wl2_ref, wr2_ref, b2_ref,
                           wl3_ref, wr3_ref, b3_ref,
                           o_ref):
    """Fused 3-layer GraphSage:
         h1 = relu( (A@x )@Wl1 + x @Wr1 + b1 )
         h2 = relu( (A@h1)@Wl2 + h1@Wr2 + b2 )
         y  =       (A@h2)@Wl3 + h2@Wr3 + b3
       A is the degree-normalized (mean) adjacency, resident in VMEM (bf16)."""
    a = a_ref[...]                                     # (Np, Np) bf16
    h = x_ref[...]                                     # (Np, Cp) f32

    def layer(h, wl_ref, wr_ref, b_ref, apply_relu):
        # mean neighbor aggregation on the bf16 MXU path, f32 accumulation
        agg = jnp.dot(a, h.astype(a.dtype),
                      preferred_element_type=jnp.float32)          # (Np, Cp)
        out = (jnp.dot(agg, wl_ref[...], preferred_element_type=jnp.float32)
               + jnp.dot(h, wr_ref[...], preferred_element_type=jnp.float32)
               + b_ref[...])
        if apply_relu:
            out = jnp.maximum(out, 0.0)
        return out

    h = layer(h, wl1_ref, wr1_ref, b1_ref, True)   # relu(conv1) (dropout = id)
    h = layer(h, wl2_ref, wr2_ref, b2_ref, True)   # relu(conv2) (dropout = id)
    h = layer(h, wl3_ref, wr3_ref, b3_ref, False)  # conv3
    o_ref[...] = h.astype(o_ref.dtype)


# ------------------------------- wrappers -----------------------------------

def build_normalized_adjacency(edge_index, num_nodes):
    """Dense A_norm[i, j] = (#edges j->i) / in_degree(i), in bf16.

    Computed ONCE per graph (hoisted out of the forward pass).
    """
    src = edge_index[0]
    dst = edge_index[1]
    a = jnp.zeros((num_nodes, num_nodes), jnp.float32)
    a = a.at[dst, src].add(1.0)                        # scatter-add edge counts
    deg = jnp.sum(a, axis=1, keepdims=True)
    a = a / jnp.maximum(deg, 1.0)                      # 0 in-degree rows -> 0
    # TODO(synk): for large graphs replace this dense N x N matrix with a CSR
    # gather formulation (PrefetchScalarGridSpec + SMEM row offsets) and a
    # row-tiled grid; dense A is only appropriate for small N.
    return a.astype(jnp.bfloat16)


def init_params(key, hidden_channels):
    """Deterministic init of 3 SAGEConv layers (lin_l has bias, lin_r doesn't)."""
    params = []
    bound = 1.0 / jnp.sqrt(jnp.float32(hidden_channels))
    keys = jax.random.split(key, 9)
    for layer in range(3):
        k_wl, k_wr, k_b = keys[3 * layer: 3 * layer + 3]
        w_l = jax.random.uniform(k_wl, (hidden_channels, hidden_channels),
                                 jnp.float32, -bound, bound)
        w_r = jax.random.uniform(k_wr, (hidden_channels, hidden_channels),
                                 jnp.float32, -bound, bound)
        b = jax.random.uniform(k_b, (1, hidden_channels),
                               jnp.float32, -bound, bound)
        params.append((w_l, w_r, b))
    return params


def pack_params(params, hidden_channels):
    """Zero-pad channels to a lane-dense width (multiple of 128).

    Padded weight rows/cols and bias entries are zero, so padded channels
    stay exactly zero through every layer (relu(0)=0).
    """
    c = hidden_channels
    cp = _round_up(max(c, LANE), LANE)
    packed = []
    for (w_l, w_r, b) in params:
        wl_p = jnp.zeros((cp, cp), jnp.float32).at[:c, :c].set(w_l)
        wr_p = jnp.zeros((cp, cp), jnp.float32).at[:c, :c].set(w_r)
        b_p = jnp.zeros((1, cp), jnp.float32).at[:, :c].set(b)
        packed.append((wl_p, wr_p, b_p))
    return packed, cp


def graph_sage_forward(packed_params, a_norm, x, dropout_rate=0.5):
    """Mirrors GraphSage.forward; dropout is identity in eval mode."""
    # TODO(synk): training-mode stochastic dropout would use
    # pltpu.prng_random_bits inside the kernel; here dropout is identity.
    del dropout_rate
    n, c = x.shape
    cp = packed_params[0][0].shape[1]
    n_p = _round_up(n, SUBLANE)

    # zero-padded, lane/sublane-aligned slabs (cheap one-off XLA pads)
    x_p = jnp.zeros((n_p, cp), jnp.float32).at[:n, :c].set(x)
    a_p = jnp.zeros((n_p, n_p), jnp.bfloat16).at[:n, :n].set(a_norm)

    (wl1, wr1, b1), (wl2, wr2, b2), (wl3, wr3, b3) = packed_params

    full = lambda i: (0, 0)
    out_p = pl.pallas_call(
        fused_graphsage_kernel,
        out_shape=jax.ShapeDtypeStruct((n_p, cp), jnp.float32),
        grid=(1,),
        in_specs=[
            pl.BlockSpec((n_p, n_p), full),          # A_norm (bf16)
            pl.BlockSpec((n_p, cp), full),           # X padded
            pl.BlockSpec((cp, cp), full),            # W_l1
            pl.BlockSpec((cp, cp), full),            # W_r1
            pl.BlockSpec((1, cp), full),             # b1
            pl.BlockSpec((cp, cp), full),            # W_l2
            pl.BlockSpec((cp, cp), full),            # W_r2
            pl.BlockSpec((1, cp), full),             # b2
            pl.BlockSpec((cp, cp), full),            # W_l3
            pl.BlockSpec((cp, cp), full),            # W_r3
            pl.BlockSpec((1, cp), full),             # b3
        ],
        out_specs=pl.BlockSpec((n_p, cp), full),
        compiler_params=pltpu.CompilerParams(
            dimension_semantics=("arbitrary",)),
        # TODO(synk): for N beyond a few thousand nodes, switch to a row-tiled
        # grid over A (pl.BlockSpec((tm, Np))) marked "parallel" so it shards
        # across TensorCores and stays within VMEM.
    )(a_p, x_p, wl1, wr1, b1, wl2, wr2, b2, wl3, wr3, b3)

    return out_p[:n, :c]


# ---------------------------- pure-JAX reference -----------------------------

def graph_sage_reference(params, a_norm_bf16, x):
    """Straightforward JAX mirror of the PyTorch module (for validation)."""
    a = a_norm_bf16.astype(jnp.float32)
    h = x
    for layer, (w_l, w_r, b) in enumerate(params):
        agg = a @ h
        h_new = agg @ w_l + h @ w_r + b
        if layer < 2:
            h_new = jnp.maximum(h_new, 0.0)
        h = h_new
    return h


# --------------------------------- main -------------------------------------

if __name__ == "__main__":
    key = jax.random.PRNGKey(0)
    k_x, k_src, k_dst, k_p = jax.random.split(key, 4)

    num_nodes = 64
    hidden_channels = 32
    num_edges = 256

    x = jax.random.normal(k_x, (num_nodes, hidden_channels), jnp.float32)
    src = jax.random.randint(k_src, (num_edges,), 0, num_nodes, jnp.int32)
    dst = jax.random.randint(k_dst, (num_edges,), 0, num_nodes, jnp.int32)
    edge_index = jnp.stack([src, dst], axis=0)      # [2, E], row0=src row1=dst

    # graph preprocessing hoisted out of the forward pass (done once per graph)
    a_norm = build_normalized_adjacency(edge_index, num_nodes)

    params = init_params(k_p, hidden_channels)
    packed_params, _ = pack_params(params, hidden_channels)

    fwd = jax.jit(graph_sage_forward)
    out = fwd(packed_params, a_norm, x)
    jax.block_until_ready(out)
    assert out.shape == (num_nodes, hidden_channels)

    ref = graph_sage_reference(params, a_norm, x)
    assert jnp.allclose(out, ref, rtol=3e-2, atol=3e-2), (
        "max abs err = %f" % float(jnp.max(jnp.abs(out - ref))))

    print("KERNEL_OK")
</pallas_src>

<mosaic_0001>
module attributes {stable_mosaic.version = 11 : i64} {
  func.func @fused_graphsage_kernel(%arg0: i32, %arg1: memref<64x64xbf16, #tpu.memory_space<vmem>>, %arg2: memref<64x128xf32, #tpu.memory_space<vmem>>, %arg3: memref<128x128xf32, #tpu.memory_space<vmem>>, %arg4: memref<128x128xf32, #tpu.memory_space<vmem>>, %arg5: memref<1x128xf32, #tpu.memory_space<vmem>>, %arg6: memref<128x128xf32, #tpu.memory_space<vmem>>, %arg7: memref<128x128xf32, #tpu.memory_space<vmem>>, %arg8: memref<1x128xf32, #tpu.memory_space<vmem>>, %arg9: memref<128x128xf32, #tpu.memory_space<vmem>>, %arg10: memref<128x128xf32, #tpu.memory_space<vmem>>, %arg11: memref<1x128xf32, #tpu.memory_space<vmem>>, %arg12: memref<64x128xf32, #tpu.memory_space<vmem>>) attributes {dimension_semantics = [#tpu.dimension_semantics<arbitrary>], iteration_bounds = array<i64: 1>, scalar_prefetch = 0 : i64, scratch_operands = 0 : i64, tpu.core_type = #tpu.core_type<tc>, window_params = [{pipeline_mode = #tpu.pipeline_mode<synchronous>, transform_indices = @transform_0, window_bounds = array<i64: 64, 64>}, {pipeline_mode = #tpu.pipeline_mode<synchronous>, transform_indices = @transform_1, window_bounds = array<i64: 64, 128>}, {pipeline_mode = #tpu.pipeline_mode<synchronous>, transform_indices = @transform_2, window_bounds = array<i64: 128, 128>}, {pipeline_mode = #tpu.pipeline_mode<synchronous>, transform_indices = @transform_3, window_bounds = array<i64: 128, 128>}, {pipeline_mode = #tpu.pipeline_mode<synchronous>, transform_indices = @transform_4, window_bounds = array<i64: 1, 128>}, {pipeline_mode = #tpu.pipeline_mode<synchronous>, transform_indices = @transform_5, window_bounds = array<i64: 128, 128>}, {pipeline_mode = #tpu.pipeline_mode<synchronous>, transform_indices = @transform_6, window_bounds = array<i64: 128, 128>}, {pipeline_mode = #tpu.pipeline_mode<synchronous>, transform_indices = @transform_7, window_bounds = array<i64: 1, 128>}, {pipeline_mode = #tpu.pipeline_mode<synchronous>, transform_indices = @transform_8, window_bounds = array<i64: 128, 128>}, {pipeline_mode = #tpu.pipeline_mode<synchronous>, transform_indices = @transform_9, window_bounds = array<i64: 128, 128>}, {pipeline_mode = #tpu.pipeline_mode<synchronous>, transform_indices = @transform_10, window_bounds = array<i64: 1, 128>}, {pipeline_mode = #tpu.pipeline_mode<synchronous>, transform_indices = @transform_11, window_bounds = array<i64: 64, 128>}]} {
    %c0 = arith.constant 0 : index
    %c0_0 = arith.constant 0 : index
    %0 = vector.load %arg1[%c0, %c0_0] : memref<64x64xbf16, #tpu.memory_space<vmem>>, vector<64x64xbf16>
    %c0_1 = arith.constant 0 : index
    %c0_2 = arith.constant 0 : index
    %1 = vector.load %arg2[%c0_1, %c0_2] : memref<64x128xf32, #tpu.memory_space<vmem>>, vector<64x128xf32>
    %2 = arith.truncf %1 : vector<64x128xf32> to vector<64x128xbf16>
    %cst = arith.constant dense<0.000000e+00> : vector<64x128xf32>
    %3 = tpu.matmul %0, %2, %cst {dimension_numbers = #tpu.dot_dimension_numbers<[1], [0], [0], [1], [0, 0, 1, 1], [], []>} : vector<64x64xbf16>, vector<64x128xbf16>, vector<64x128xf32> -> vector<64x128xf32>
    %c0_3 = arith.constant 0 : index
    %c0_4 = arith.constant 0 : index
    %4 = vector.load %arg3[%c0_3, %c0_4] : memref<128x128xf32, #tpu.memory_space<vmem>>, vector<128x128xf32>
    %cst_5 = arith.constant dense<0.000000e+00> : vector<64x128xf32>
    %5 = tpu.matmul %3, %4, %cst_5 {dimension_numbers = #tpu.dot_dimension_numbers<[1], [0], [0], [1], [0, 0, 1, 1], [], []>} : vector<64x128xf32>, vector<128x128xf32>, vector<64x128xf32> -> vector<64x128xf32>
    %c0_6 = arith.constant 0 : index
    %c0_7 = arith.constant 0 : index
    %6 = vector.load %arg4[%c0_6, %c0_7] : memref<128x128xf32, #tpu.memory_space<vmem>>, vector<128x128xf32>
    %cst_8 = arith.constant dense<0.000000e+00> : vector<64x128xf32>
    %7 = tpu.matmul %1, %6, %cst_8 {dimension_numbers = #tpu.dot_dimension_numbers<[1], [0], [0], [1], [0, 0, 1, 1], [], []>} : vector<64x128xf32>, vector<128x128xf32>, vector<64x128xf32> -> vector<64x128xf32>
    %8 = arith.addf %5, %7 : vector<64x128xf32>
    %c0_9 = arith.constant 0 : index
    %c0_10 = arith.constant 0 : index
    %9 = vector.load %arg5[%c0_9, %c0_10] : memref<1x128xf32, #tpu.memory_space<vmem>>, vector<1x128xf32>
    %10 = vector.broadcast %9 : vector<1x128xf32> to vector<64x128xf32>
    %11 = arith.addf %8, %10 : vector<64x128xf32>
    %cst_11 = arith.constant 0.000000e+00 : f32
    %12 = vector.broadcast %cst_11 : f32 to vector<64x128xf32>
    %13 = arith.maximumf %11, %12 : vector<64x128xf32>
    %14 = arith.truncf %13 : vector<64x128xf32> to vector<64x128xbf16>
    %cst_12 = arith.constant dense<0.000000e+00> : vector<64x128xf32>
    %15 = tpu.matmul %0, %14, %cst_12 {dimension_numbers = #tpu.dot_dimension_numbers<[1], [0], [0], [1], [0, 0, 1, 1], [], []>} : vector<64x64xbf16>, vector<64x128xbf16>, vector<64x128xf32> -> vector<64x128xf32>
    %c0_13 = arith.constant 0 : index
    %c0_14 = arith.constant 0 : index
    %16 = vector.load %arg6[%c0_13, %c0_14] : memref<128x128xf32, #tpu.memory_space<vmem>>, vector<128x128xf32>
    %cst_15 = arith.constant dense<0.000000e+00> : vector<64x128xf32>
    %17 = tpu.matmul %15, %16, %cst_15 {dimension_numbers = #tpu.dot_dimension_numbers<[1], [0], [0], [1], [0, 0, 1, 1], [], []>} : vector<64x128xf32>, vector<128x128xf32>, vector<64x128xf32> -> vector<64x128xf32>
    %c0_16 = arith.constant 0 : index
    %c0_17 = arith.constant 0 : index
    %18 = vector.load %arg7[%c0_16, %c0_17] : memref<128x128xf32, #tpu.memory_space<vmem>>, vector<128x128xf32>
    %cst_18 = arith.constant dense<0.000000e+00> : vector<64x128xf32>
    %19 = tpu.matmul %13, %18, %cst_18 {dimension_numbers = #tpu.dot_dimension_numbers<[1], [0], [0], [1], [0, 0, 1, 1], [], []>} : vector<64x128xf32>, vector<128x128xf32>, vector<64x128xf32> -> vector<64x128xf32>
    %20 = arith.addf %17, %19 : vector<64x128xf32>
    %c0_19 = arith.constant 0 : index
    %c0_20 = arith.constant 0 : index
    %21 = vector.load %arg8[%c0_19, %c0_20] : memref<1x128xf32, #tpu.memory_space<vmem>>, vector<1x128xf32>
    %22 = vector.broadcast %21 : vector<1x128xf32> to vector<64x128xf32>
    %23 = arith.addf %20, %22 : vector<64x128xf32>
    %cst_21 = arith.constant 0.000000e+00 : f32
    %24 = vector.broadcast %cst_21 : f32 to vector<64x128xf32>
    %25 = arith.maximumf %23, %24 : vector<64x128xf32>
    %26 = arith.truncf %25 : vector<64x128xf32> to vector<64x128xbf16>
    %cst_22 = arith.constant dense<0.000000e+00> : vector<64x128xf32>
    %27 = tpu.matmul %0, %26, %cst_22 {dimension_numbers = #tpu.dot_dimension_numbers<[1], [0], [0], [1], [0, 0, 1, 1], [], []>} : vector<64x64xbf16>, vector<64x128xbf16>, vector<64x128xf32> -> vector<64x128xf32>
    %c0_23 = arith.constant 0 : index
    %c0_24 = arith.constant 0 : index
    %28 = vector.load %arg9[%c0_23, %c0_24] : memref<128x128xf32, #tpu.memory_space<vmem>>, vector<128x128xf32>
    %cst_25 = arith.constant dense<0.000000e+00> : vector<64x128xf32>
    %29 = tpu.matmul %27, %28, %cst_25 {dimension_numbers = #tpu.dot_dimension_numbers<[1], [0], [0], [1], [0, 0, 1, 1], [], []>} : vector<64x128xf32>, vector<128x128xf32>, vector<64x128xf32> -> vector<64x128xf32>
    %c0_26 = arith.constant 0 : index
    %c0_27 = arith.constant 0 : index
    %30 = vector.load %arg10[%c0_26, %c0_27] : memref<128x128xf32, #tpu.memory_space<vmem>>, vector<128x128xf32>
    %cst_28 = arith.constant dense<0.000000e+00> : vector<64x128xf32>
    %31 = tpu.matmul %25, %30, %cst_28 {dimension_numbers = #tpu.dot_dimension_numbers<[1], [0], [0], [1], [0, 0, 1, 1], [], []>} : vector<64x128xf32>, vector<128x128xf32>, vector<64x128xf32> -> vector<64x128xf32>
    %32 = arith.addf %29, %31 : vector<64x128xf32>
    %c0_29 = arith.constant 0 : index
    %c0_30 = arith.constant 0 : index
    %33 = vector.load %arg11[%c0_29, %c0_30] : memref<1x128xf32, #tpu.memory_space<vmem>>, vector<1x128xf32>
    %34 = vector.broadcast %33 : vector<1x128xf32> to vector<64x128xf32>
    %35 = arith.addf %32, %34 : vector<64x128xf32>
    %c0_31 = arith.constant 0 : index
    %c0_32 = arith.constant 0 : index
    %36 = vector.load %arg12[%c0_31, %c0_32] : memref<64x128xf32, #tpu.memory_space<vmem>>, vector<64x128xf32>
    tpu.vector_store %arg12[%c0_31, %c0_32], %35 {strides = array<i32>} : memref<64x128xf32, #tpu.memory_space<vmem>>, vector<64x128xf32>,
    return
  }
  func.func @transform_0(%arg0: i32) -> (i32, i32) {
    %c0_i32 = arith.constant 0 : i32
    %c0_i32_0 = arith.constant 0 : i32
    %c0_i32_1 = arith.constant 0 : i32
    return %c0_i32, %c0_i32_0 : i32, i32
  }
  func.func @transform_1(%arg0: i32) -> (i32, i32) {
    %c0_i32 = arith.constant 0 : i32
    %c0_i32_0 = arith.constant 0 : i32
    %c0_i32_1 = arith.constant 0 : i32
    return %c0_i32, %c0_i32_0 : i32, i32
  }
  func.func @transform_2(%arg0: i32) -> (i32, i32) {
    %c0_i32 = arith.constant 0 : i32
    %c0_i32_0 = arith.constant 0 : i32
    %c0_i32_1 = arith.constant 0 : i32
    return %c0_i32, %c0_i32_0 : i32, i32
  }
  func.func @transform_3(%arg0: i32) -> (i32, i32) {
    %c0_i32 = arith.constant 0 : i32
    %c0_i32_0 = arith.constant 0 : i32
    %c0_i32_1 = arith.constant 0 : i32
    return %c0_i32, %c0_i32_0 : i32, i32
  }
  func.func @transform_4(%arg0: i32) -> (i32, i32) {
    %c0_i32 = arith.constant 0 : i32
    %c0_i32_0 = arith.constant 0 : i32
    %c0_i32_1 = arith.constant 0 : i32
    return %c0_i32, %c0_i32_0 : i32, i32
  }
  func.func @transform_5(%arg0: i32) -> (i32, i32) {
    %c0_i32 = arith.constant 0 : i32
    %c0_i32_0 = arith.constant 0 : i32
    %c0_i32_1 = arith.constant 0 : i32
    return %c0_i32, %c0_i32_0 : i32, i32
  }
  func.func @transform_6(%arg0: i32) -> (i32, i32) {
    %c0_i32 = arith.constant 0 : i32
    %c0_i32_0 = arith.constant 0 : i32
    %c0_i32_1 = arith.constant 0 : i32
    return %c0_i32, %c0_i32_0 : i32, i32
  }
  func.func @transform_7(%arg0: i32) -> (i32, i32) {
    %c0_i32 = arith.constant 0 : i32
    %c0_i32_0 = arith.constant 0 : i32
    %c0_i32_1 = arith.constant 0 : i32
    return %c0_i32, %c0_i32_0 : i32, i32
  }
  func.func @transform_8(%arg0: i32) -> (i32, i32) {
    %c0_i32 = arith.constant 0 : i32
    %c0_i32_0 = arith.constant 0 : i32
    %c0_i32_1 = arith.constant 0 : i32
    return %c0_i32, %c0_i32_0 : i32, i32
  }
  func.func @transform_9(%arg0: i32) -> (i32, i32) {
    %c0_i32 = arith.constant 0 : i32
    %c0_i32_0 = arith.constant 0 : i32
    %c0_i32_1 = arith.constant 0 : i32
    return %c0_i32, %c0_i32_0 : i32, i32
  }
  func.func @transform_10(%arg0: i32) -> (i32, i32) {
    %c0_i32 = arith.constant 0 : i32
    %c0_i32_0 = arith.constant 0 : i32
    %c0_i32_1 = arith.constant 0 : i32
    return %c0_i32, %c0_i32_0 : i32, i32
  }
  func.func @transform_11(%arg0: i32) -> (i32, i32) {
    %c0_i32 = arith.constant 0 : i32
    %c0_i32_0 = arith.constant 0 : i32
    %c0_i32_1 = arith.constant 0 : i32
    return %c0_i32, %c0_i32_0 : i32, i32
  }
}

</mosaic_0001>

<bundles_post_ra>
// kernel: graph_sage_forward.1
= control target key start
LH: loop header
LB: loop body
LE: loop exit
PB: predicated region body
PF: predicated region fallthrough
CT: control target
= control target key end

     0   :  { %16 = vsyncpa [#allocation3], 0  ;;  %s2597_s0 = inlined_call_operand.hbm [shape: bf16[64,64], index: 0, kind: input, shape index: {}]   ;;  %s2598_s1 = inlined_call_operand.vmem [shape: f32[64,128], index: 1, kind: input, shape index: {}]   ;;  %s2599_s2 = inlined_call_operand.vmem [shape: f32[128,128], index: 2, kind: input, shape index: {}]   ;;  %s2600_s3 = inlined_call_operand.vmem [shape: f32[128,128], index: 3, kind: input, shape index: {}]   ;;  %s2601_s4 = inlined_call_operand.hbm [shape: f32[1,128], index: 4, kind: input, shape index: {}]   ;;  %s2602_s5 = inlined_call_operand.hbm [shape: f32[128,128], index: 5, kind: input, shape index: {}]   ;;  %s2603_s6 = inlined_call_operand.hbm [shape: f32[128,128], index: 6, kind: input, shape index: {}]   ;;  %s2604_s7 = inlined_call_operand.hbm [shape: f32[1,128], index: 7, kind: input, shape index: {}]   ;;  %s2605_s8 = inlined_call_operand.hbm [shape: f32[128,128], index: 8, kind: input, shape index: {}]   ;;  %s2606_s9 = inlined_call_operand.vmem [shape: f32[128,128], index: 9, kind: input, shape index: {}]   ;;  %s2607_s10 = inlined_call_operand.hbm [shape: f32[1,128], index: 10, kind: input, shape index: {}]   ;;  %s2608_s11 = inlined_call_operand.vmem [shape: f32[64,128], index: 11, kind: output, shape index: {}]  }
   0x1   :  { %17 = vsyncpa [#allocation5], 0 }
   0x2   :  { %18 = vsyncpa [#allocation8], 0 }
   0x3   :  { %19 = vsyncpa [#allocation11], 0  ;;  %s2079_s17 = smov [#allocation4]   ;;  %s1917_s21 = scalar_lea.hbm %s2601_s4, 16 }
   0x4   :  { %s44_s18 = sshll.u32 %s2079_s17, 4  ;;  %p1918_p0 = scmp.ne.s32.totalorder %s2601_s4, %s1917_s21  ;;  %s45_s18 = int_to_ptr.vmem [resolvable:$true] %s44_s18 }
   0x5   :  { %p1921_p1 = scmp.lt.u32.totalorder %s1917_s21, %s2601_s4 }
   0x7   :  { %p1923_p2 = pnand %p1921_p1, %p1918_p0 }
   0x9   :  { %1926 = shalt.err (!%p1923_p2)
}
   0xa   :  { %s1927_s26 = scalar_lea.vmem %s45_s18, 16  ;;  %s1931_s27 = scalar_lea.vmem %s45_s18, 32 }
   0xb   :  { %p1928_p3 = scmp.ne.s32.totalorder %s45_s18, %s1927_s26  ;;  %p1932_p4 = scmp.lt.s32.totalorder %s45_s18, %s45_s18 }
   0xc   :  { %p1933_p5 = scmp.lt.s32.totalorder %s1931_s27, %s1927_s26 }
   0xe   :  { %p1934_p6 = por %p1933_p5, %p1932_p4 }
  0x10   :  { %p1935_p7 = pnand %p1934_p6, %p1928_p3 }
  0x12   :  { %1938 = shalt.err (!%p1935_p7)
}
  0x13   :  { %47 = dma.hbm_to_vmem [thread:$0]  %s2601_s4, 16, %s45_s18, [#allocation5]  }
  0x14   :  { %s2080_s30 = smov [#allocation7]   ;;  %s2081_s13 = smov [#allocation10]  }
  0x15   :  { %s65_s12 = sshll.u32 %s2080_s30, 4  ;;  %s87_s14 = sshll.u32 %s2081_s13, 4  ;;  %s66_s12 = int_to_ptr.vmem [resolvable:$true] %s65_s12  ;;  %s88_s14 = int_to_ptr.vmem [resolvable:$true] %s87_s14 }
  0x16   :  { %s1939_s17 = scalar_lea.hbm %s2603_s6, 2048 }
  0x17   :  { %p1940_p8 = scmp.ne.s32.totalorder %s2603_s6, %s1939_s17  ;;  %p1943_p9 = scmp.lt.u32.totalorder %s1939_s17, %s2603_s6 }
  0x19   :  { %p1945_p10 = pnand %p1943_p9, %p1940_p8 }
  0x1b   :  { %1948 = shalt.err (!%p1945_p10)
}
  0x1c   :  { %s1949_s4 = scalar_lea.vmem %s66_s12, 2048  ;;  %p1954_p12 = scmp.lt.s32.totalorder %s66_s12, %s66_s12 }
  0x1d   :  { %p1950_p11 = scmp.ne.s32.totalorder %s66_s12, %s1949_s4  ;;  %p1955_p13 = scmp.lt.s32.totalorder %s1949_s4, %s1949_s4 }
  0x1f   :  { %p1956_p0 = por %p1955_p13, %p1954_p12 }
  0x21   :  { %p1957_p1 = pnand %p1956_p0, %p1950_p11 }
  0x23   :  { %1960 = shalt.err (!%p1957_p1)
}
  0x24   :  { %s2082_s18 = smov 128   ;;  %s2083_s23 = smov 8  }
  0x25   :  { %71 = dma.hbm_to_vmem [thread:$0]  %s2603_s6, 2048, %s66_s12, [#allocation8], %s2082_s18, %s2082_s18, %s2083_s23  }
  0x26   :  { %s1961_s28 = scalar_lea.hbm %s2605_s8, 2048 }
  0x27   :  { %p1962_p2 = scmp.ne.s32.totalorder %s2605_s8, %s1961_s28  ;;  %p1965_p3 = scmp.lt.u32.totalorder %s1961_s28, %s2605_s8 }
  0x29   :  { %p1967_p4 = pnand %p1965_p3, %p1962_p2 }
  0x2b   :  { %1970 = shalt.err (!%p1967_p4)
}
  0x2c   :  { %s1971_s16 = scalar_lea.vmem %s88_s14, 2048  ;;  %p1976_p6 = scmp.lt.s32.totalorder %s88_s14, %s88_s14 }
  0x2d   :  { %p1972_p5 = scmp.ne.s32.totalorder %s88_s14, %s1971_s16  ;;  %p1977_p7 = scmp.lt.s32.totalorder %s1971_s16, %s1971_s16 }
  0x2f   :  { %p1978_p8 = por %p1977_p7, %p1976_p6 }
  0x31   :  { %p1979_p9 = pnand %p1978_p8, %p1972_p5 }
  0x33   :  { %1982 = shalt.err (!%p1979_p9)
}
  0x34   :  { %93 = dma.hbm_to_vmem [thread:$0]  %s2605_s8, 2048, %s88_s14, [#allocation11], %s2082_s18, %s2082_s18, %s2083_s23  }
  0x35   :  { %s2084_s17 = smov [#allocation2]   ;;  %s1983_s22 = scalar_lea.hbm %s2597_s0, 512 }
  0x36   :  { %s25_s19 = sshll.u32 %s2084_s17, 4  ;;  %p1984_p10 = scmp.ne.s32.totalorder %s2597_s0, %s1983_s22  ;;  %s26_s19 = int_to_ptr.vmem [resolvable:$true] %s25_s19 }
  0x37   :  { %p1987_p11 = scmp.lt.u32.totalorder %s1983_s22, %s2597_s0 }
  0x39   :  { %p1989_p12 = pnand %p1987_p11, %p1984_p10 }
  0x3b   :  { %1992 = shalt.err (!%p1989_p12)
}
  0x3c   :  { %s1993_s27 = scalar_lea.vmem %s26_s19, 512  ;;  %p1998_p0 = scmp.lt.s32.totalorder %s26_s19, %s26_s19 }
  0x3d   :  { %p1994_p13 = scmp.ne.s32.totalorder %s26_s19, %s1993_s27  ;;  %p1999_p1 = scmp.lt.s32.totalorder %s1993_s27, %s1993_s27 }
  0x3f   :  { %p2000_p2 = por %p1999_p1, %p1998_p0 }
  0x41   :  { %p2001_p3 = pnand %p2000_p2, %p1994_p13 }
  0x43   :  { %2004 = shalt.err (!%p2001_p3)
}
  0x44   :  { %s2085_s8 = smov 64   ;;  %s2086_s14 = smov 4  }
  0x45   :  { %31 = dma.hbm_to_vmem [thread:$0]  %s2597_s0, 512, %s26_s19, [#allocation3], %s2085_s8, %s2085_s8, %s2086_s14  }
  0x46   :  { %s2087_s30 = smov [#allocation6]   ;;  %s2088_s15 = smov [#allocation9]  }
  0x47   :  { %s53_s13 = sshll.u32 %s2087_s30, 4  ;;  %s78_s16 = sshll.u32 %s2088_s15, 4  ;;  %s54_s13 = int_to_ptr.vmem [resolvable:$true] %s53_s13  ;;  %s79_s16 = int_to_ptr.vmem [resolvable:$true] %s78_s16 }
  0x48   :  { %s2005_s17 = scalar_lea.hbm %s2602_s5, 2048 }
  0x49   :  { %p2006_p4 = scmp.ne.s32.totalorder %s2602_s5, %s2005_s17  ;;  %p2009_p5 = scmp.lt.u32.totalorder %s2005_s17, %s2602_s5 }
  0x4b   :  { %p2011_p6 = pnand %p2009_p5, %p2006_p4 }
  0x4d   :  { %2014 = shalt.err (!%p2011_p6)
}
  0x4e   :  { %s2015_s0 = scalar_lea.vmem %s54_s13, 2048  ;;  %p2020_p8 = scmp.lt.s32.totalorder %s54_s13, %s54_s13 }
  0x4f   :  { %p2016_p7 = scmp.ne.s32.totalorder %s54_s13, %s2015_s0  ;;  %p2021_p9 = scmp.lt.s32.totalorder %s2015_s0, %s2015_s0 }
  0x51   :  { %p2022_p10 = por %p2021_p9, %p2020_p8 }
  0x53   :  { %p2023_p11 = pnand %p2022_p10, %p2016_p7 }
  0x55   :  { %2026 = shalt.err (!%p2023_p11)
}
  0x56   :  { %59 = dma.hbm_to_vmem [thread:$0]  %s2602_s5, 2048, %s54_s13, [#allocation5], %s2082_s18, %s2082_s18, %s2083_s23  }
  0x57   :  { %s2027_s27 = scalar_lea.hbm %s2604_s7, 16 }
  0x58   :  { %p2028_p12 = scmp.ne.s32.totalorder %s2604_s7, %s2027_s27  ;;  %p2031_p13 = scmp.lt.u32.totalorder %s2027_s27, %s2604_s7 }
  0x5a   :  { %p2033_p0 = pnand %p2031_p13, %p2028_p12 }
  0x5c   :  { %2036 = shalt.err (!%p2033_p0)
}
  0x5d   :  { %s2037_s30 = scalar_lea.vmem %s79_s16, 16  ;;  %s2041_s15 = scalar_lea.vmem %s79_s16, 32 }
  0x5e   :  { %p2038_p1 = scmp.ne.s32.totalorder %s79_s16, %s2037_s30  ;;  %p2042_p2 = scmp.lt.s32.totalorder %s79_s16, %s79_s16 }
  0x5f   :  { %p2043_p3 = scmp.lt.s32.totalorder %s2041_s15, %s2037_s30 }
  0x61   :  { %p2044_p4 = por %p2043_p3, %p2042_p2 }
  0x63   :  { %p2045_p5 = pnand %p2044_p4, %p2038_p1 }
  0x65   :  { %2048 = shalt.err (!%p2045_p5)
}
  0x66   :  { %81 = dma.hbm_to_vmem [thread:$0]  %s2604_s7, 16, %s79_s16, [#allocation8]  }
  0x67   :  { %s2089_s23 = smov [#allocation12]   ;;  %s2049_s17 = scalar_lea.hbm %s2607_s10, 16 }
  0x68   :  { %s102_s13 = sshll.u32 %s2089_s23, 4  ;;  %p2050_p6 = scmp.ne.s32.totalorder %s2607_s10, %s2049_s17  ;;  %s103_s13 = int_to_ptr.vmem [resolvable:$true] %s102_s13 }
  0x69   :  { %p2053_p7 = scmp.lt.u32.totalorder %s2049_s17, %s2607_s10 }
  0x6b   :  { %p2055_p8 = pnand %p2053_p7, %p2050_p6 }
  0x6d   :  { %2058 = shalt.err (!%p2055_p8)
}
  0x6e   :  { %s2059_s0 = scalar_lea.vmem %s103_s13, 16  ;;  %s2063_s7 = scalar_lea.vmem %s103_s13, 32 }
  0x6f   :  { %p2060_p9 = scmp.ne.s32.totalorder %s103_s13, %s2059_s0  ;;  %p2064_p10 = scmp.lt.s32.totalorder %s103_s13, %s103_s13 }
  0x70   :  { %p2065_p11 = scmp.lt.s32.totalorder %s2063_s7, %s2059_s0 }
  0x72   :  { %p2066_p12 = por %p2065_p11, %p2064_p10 }
  0x74   :  { %p2067_p13 = pnand %p2066_p12, %p2060_p9 }
  0x76   :  { %2070 = shalt.err (!%p2067_p13)
}
  0x77   :  { %105 = dma.hbm_to_vmem [thread:$0]  %s2607_s10, 16, %s103_s13, [#allocation11]  }
  0x78   :  { %2071 = dma.done.wait [#allocation3], 512  }
  0x79   :  { %2072 = vsyncadd [#allocation3], 4294966784 }
  0x7a   :  { %2073 = dma.done.wait [#allocation5], 2064  }
  0x7b   :  { %2074 = vsyncadd [#allocation5], 4294965232 }
  0x7c   :  { %2075 = dma.done.wait [#allocation8], 2064  }
  0x7d   :  { %2076 = vsyncadd [#allocation8], 4294965232 }
  0x7e   :  { %2077 = dma.done.wait [#allocation11], 2064  }
  0x7f   :  { %2078 = vsyncadd [#allocation11], 4294965232  ;;  %v2246_v0 = vld [vmem:[%s2598_s1] sm:$0xff]  ;;  %v2251_v1 = vld [vmem:[%s2598_s1 + $0x8] sm:$0xff]  ;;  %vm168_vm0 = vcmask 523264  }
  0x80   :  { %v2256_v2 = vld [vmem:[%s2598_s1 + $0x10] sm:$0xff]  ;;  %v144_v3 = vpack.c.bf16 %v2251_v1, %v2246_v0  ;;  %v2263_v4 = vld [vmem:[%s2598_s1 + $0x18] sm:$0xff]  ;;  %v2270_v6 = vld [vmem:[%s2598_s1 + $0x20] sm:$0xff] }
  0x81   :  { %v145_v5 = vpack.c.bf16 %v2263_v4, %v2256_v2  ;;  %v2275_v7 = vld [vmem:[%s2598_s1 + $0x28] sm:$0xff]  ;;  %v2277_v8 = vld [vmem:[#allocation2] sm:$0xff]   ;;  %v2286_v10 = vld [vmem:[%s2598_s1 + $0x30] sm:$0xff] }
  0x82   :  { %1374 = vmatprep.subr.bf16.mxu0 %v144_v3  ;;  %v146_v9 = vpack.c.bf16 %v2275_v7, %v2270_v6  ;;  %1382 = vmatprep.mubr.msk.bf16.mxu0 %vm168_vm0, %v2277_v8  ;;  %v2291_v11 = vld [vmem:[%s2598_s1 + $0x38] sm:$0xff]  ;;  %v246_v12 = vld [vmem:[%s2599_s2] sm:$0xff]  ;;  %v247_v13 = vld [vmem:[%s2599_s2 + $0x8] sm:$0xff] }
  0x83   :  { %1375 = vmatpush3.bf16.msra.mxu0 %v144_v3  ;;  %v1718_v14 = vpack.c.bf16 %v247_v13, %v246_v12  ;;  %v248_v15 = vld [vmem:[%s2599_s2 + $0x10] sm:$0xff]  ;;  %v147_v16 = vpack.c.bf16 %v2291_v11, %v2286_v10  ;;  %v262_v17 = vld [vmem:[%s2600_s3] sm:$0xff]  ;;  %v249_v18 = vld [vmem:[%s2599_s2 + $0x18] sm:$0xff] }
  0x84   :  { %1376 = vmatprep.subr.bf16.mxu0 %v145_v5  ;;  %v263_v19 = vld [vmem:[%s2600_s3 + $0x8] sm:$0xff]  ;;  %v1722_v20 = vpack.c.bf16 %v249_v18, %v248_v15  ;;  %v250_v21 = vld [vmem:[%s2599_s2 + $0x20] sm:$0xff]  ;;  %v264_v25 = vld [vmem:[%s2600_s3 + $0x10] sm:$0xff] }
  0x85   :  { %1719 = vmatprep.subr.bf16.mxu1 %v1718_v14  ;;  %v251_v22 = vld [vmem:[%s2599_s2 + $0x28] sm:$0xff]  ;;  %v1686_v24 = vpack.c.bf16 %v263_v19, %v262_v17  ;;  %v265_v26 = vld [vmem:[%s2600_s3 + $0x18] sm:$0xff]  ;;  %v252_v27 = vld [vmem:[%s2599_s2 + $0x30] sm:$0xff] }
  0x86   :  { %1721 = vmatpush3.bf16.msra.mxu1 %v1718_v14  ;;  %v1726_v23 = vpack.c.bf16 %v251_v22, %v250_v21  ;;  %v253_v28 = vld [vmem:[%s2599_s2 + $0x38] sm:$0xff]  ;;  %v2331_v29 = vld [vmem:[#allocation2 + $0x8] sm:$0xff]   ;;  %v2333_v30 = vld [vmem:[#allocation2 + $0x10] sm:$0xff]   ;;  %v1690_v31 = vpack.c.bf16 %v265_v26, %v264_v25 }
  0x87   :  { %1377 = vmatpush3.bf16.msra.mxu0 %v145_v5  ;;  %1723 = vmatprep.subr.bf16.mxu1 %v1722_v20  ;;  %v1730_v32 = vpack.c.bf16 %v253_v28, %v252_v27  ;;  %v254_v33 = vld [vmem:[%s2599_s2 + $0x40] sm:$0xff]  ;;  %v255_v34 = vld [vmem:[%s2599_s2 + $0x48] sm:$0xff]  ;;  %v256_v39 = vld [vmem:[%s2599_s2 + $0x50] sm:$0xff] }
  0x88   :  { %1378 = vmatprep.subr.bf16.mxu0 %v146_v9  ;;  %v266_v35 = vld [vmem:[%s2600_s3 + $0x20] sm:$0xff]  ;;  %v267_v36 = vld [vmem:[%s2600_s3 + $0x28] sm:$0xff]  ;;  %v1734_v37 = vpack.c.bf16 %v255_v34, %v254_v33  ;;  %v257_v40 = vld [vmem:[%s2599_s2 + $0x58] sm:$0xff] }
  0x89   :  { %v1694_v38 = vpack.c.bf16 %v267_v36, %v266_v35  ;;  %v268_v41 = vld [vmem:[%s2600_s3 + $0x30] sm:$0xff]  ;;  %v269_v42 = vld [vmem:[%s2600_s3 + $0x38] sm:$0xff]  ;;  %v1738_v44 = vpack.c.bf16 %v257_v40, %v256_v39  ;;  %v258_v46 = vld [vmem:[%s2599_s2 + $0x60] sm:$0xff] }
  0x8a   :  { %1725 = vmatpush3.bf16.msra.mxu1 %v1722_v20  ;;  %v2363_v43 = vld [vmem:[#allocation2 + $0x18] sm:$0xff]   ;;  %v1698_v45 = vpack.c.bf16 %v269_v42, %v268_v41  ;;  %v259_v47 = vld [vmem:[%s2599_s2 + $0x68] sm:$0xff]  ;;  %v270_v48 = vld [vmem:[%s2600_s3 + $0x40] sm:$0xff] }
  0x8b   :  { %1379 = vmatpush3.bf16.msra.mxu0 %v146_v9  ;;  %1727 = vmatprep.subr.bf16.mxu1 %v1726_v23  ;;  %v271_v49 = vld [vmem:[%s2600_s3 + $0x48] sm:$0xff]  ;;  %v1742_v50 = vpack.c.bf16 %v259_v47, %v258_v46  ;;  %v272_v52 = vld [vmem:[%s2600_s3 + $0x50] sm:$0xff]  ;;  %v273_v53 = vld [vmem:[%s2600_s3 + $0x58] sm:$0xff] }
  0x8c   :  { %1380 = vmatprep.subr.bf16.mxu0 %v147_v16  ;;  %v1702_v51 = vpack.c.bf16 %v271_v49, %v270_v48  ;;  %v1706_v54 = vpack.c.bf16 %v273_v53, %v272_v52  ;;  %v274_v55 = vld [vmem:[%s2600_s3 + $0x60] sm:$0xff]  ;;  %v275_v56 = vld [vmem:[%s2600_s3 + $0x68] sm:$0xff]  ;;  %v276_v58 = vld [vmem:[%s2600_s3 + $0x70] sm:$0xff] }
  0x8d   :  { %v1710_v57 = vpack.c.bf16 %v275_v56, %v274_v55  ;;  %v277_v59 = vld [vmem:[%s2600_s3 + $0x78] sm:$0xff]  ;;  %v260_v61 = vld [vmem:[%s2599_s2 + $0x70] sm:$0xff]  ;;  %v1195_v18 = vld [vmem:[#allocation4] ss:$0 sm:$0xff] }
  0x8e   :  { %1729 = vmatpush3.bf16.msra.mxu1 %v1726_v23  ;;  %v1714_v60 = vpack.c.bf16 %v277_v59, %v276_v58  ;;  %v261_v62 = vld [vmem:[%s2599_s2 + $0x78] sm:$0xff]  ;;  %v597_v55 = vld [vmem:[#allocation7 + $0x8] sm:$0xff] }
  0x8f   :  { %1381 = vmatpush3.bf16.msra.mxu0 %v147_v16  ;;  %1731 = vmatprep.subr.bf16.mxu1 %v1730_v32  ;;  %v1746_v63 = vpack.c.bf16 %v261_v62, %v260_v61  ;;  %v598_v59 = vld [vmem:[#allocation7 + $0x10] sm:$0xff]  ;;  %v600_v62 = vld [vmem:[#allocation7 + $0x20] sm:$0xff] }
  0x90   :  { %1687 = vmatprep.subr.bf16.mxu0 %v1686_v24 }
  0x92   :  { %1383 = vmatmul.mubr.msk.bf16.vlgmr.msra.gmra.mrb[0].mxu0 %vm168_vm0, %v2331_v29  ;;  %1733 = vmatpush3.bf16.msra.mxu1 %v1730_v32 }
  0x93   :  { %1386 = vmatprep.mubr.msk.bf16.mxu0 %vm168_vm0, %v2333_v30  ;;  %1689 = vmatpush3.bf16.msra.mxu0 %v1686_v24 }
  0x94   :  { %1691 = vmatprep.subr.bf16.mxu0 %v1690_v31  ;;  %1735 = vmatprep.subr.bf16.mxu1 %v1734_v37 }
  0x96   :  { %1737 = vmatpush3.bf16.msra.mxu1 %v1734_v37 }
  0x97   :  { %1693 = vmatpush3.bf16.msra.mxu0 %v1690_v31  ;;  %1739 = vmatprep.subr.bf16.mxu1 %v1738_v44 }
  0x98   :  { %1695 = vmatprep.subr.bf16.mxu0 %v1694_v38 }
  0x9a   :  { %1387 = vmatmul.mubr.msk.bf16.gmra.mrb[4].mxu0 %vm168_vm0, %v2363_v43  ;;  %1741 = vmatpush3.bf16.msra.mxu1 %v1738_v44 }
  0x9b   :  { %1697 = vmatpush3.bf16.msra.mxu0 %v1694_v38  ;;  %1422 = vmatprep.mubr.f32.mxu0 %v2246_v0 }
  0x9c   :  { %1699 = vmatprep.subr.bf16.mxu0 %v1698_v45  ;;  %1743 = vmatprep.subr.bf16.mxu1 %v1742_v50 }
  0x9e   :  { %1745 = vmatpush3.bf16.msra.mxu1 %v1742_v50 }
  0x9f   :  { %1701 = vmatpush3.bf16.msra.mxu0 %v1698_v45  ;;  %1747 = vmatprep.subr.bf16.mxu1 %v1746_v63 }
  0xa0   :  { %1703 = vmatprep.subr.bf16.mxu0 %v1702_v51 }
  0xa2   :  { %1749 = vmatpush3.bf16.msra.mxu1 %v1746_v63  ;;  %v601_v63 = vld [vmem:[#allocation7 + $0x28] sm:$0xff] }
  0xa3   :  { %1705 = vmatpush3.bf16.msra.mxu0 %v1702_v51 }
  0xa4   :  { %1707 = vmatprep.subr.bf16.mxu0 %v1706_v54 }
  0xa7   :  { %1709 = vmatpush3.bf16.msra.mxu0 %v1706_v54  ;;  %v596_v54 = vld [vmem:[#allocation7] sm:$0xff] }
  0xa8   :  { %1711 = vmatprep.subr.bf16.mxu0 %v1710_v57  ;;  %v1750_v58 = vpack.c.bf16 %v597_v55, %v596_v54 }
  0xab   :  { %1713 = vmatpush3.bf16.msra.mxu0 %v1710_v57 }
  0xac   :  { %1715 = vmatprep.subr.bf16.mxu0 %v1714_v60 }
  0xaf   :  { %1717 = vmatpush3.bf16.msra.mxu0 %v1714_v60  ;;  %v599_v60 = vld [vmem:[#allocation7 + $0x18] sm:$0xff] }
  0xb0   :  { %v1754_v61 = vpack.c.bf16 %v599_v60, %v598_v59 }
  0xb2   :  { %1423 = vmatmul.mubr.f32.vlgmr.msra.gmra.mrb[8].mxu0 %v2251_v1 }
  0xb3   :  { %1425 = vmatprep.mubr.f32.mxu0 %v2256_v2 }
  0xb6   :  { %1426 = vmatmul.mubr.f32.gmra.mrb[10].mxu0 %v2263_v4 }
  0xb7   :  { %1428 = vmatprep.mubr.f32.mxu0 %v2270_v6 }
  0xba   :  { %1429 = vmatmul.mubr.f32.gmra.mrb[12].mxu0 %v2275_v7 }
  0xbb   :  { %1431 = vmatprep.mubr.f32.mxu0 %v2286_v10 }
  0xbe   :  { %1432 = vmatmul.mubr.f32.gmra.mrb[14].mxu0 %v2291_v11 }
  0xbf   :  { %1486 = vmatprep.mubr.msk.bf16.mxu0 %vm168_vm0, %v2277_v8 }
 0x165   :  { %v1384_v0 = vpop.f32.mrb[0].mxu0 }
 0x166   :  { %v215_v1 = vpop.f32.mrb[1].mxu0 }
 0x167   :  { %v1385_v2 = vpop.f32.mrb[2].mxu0  ;;  %1466 = vmatprep.mubr.f32.mxu1 %v215_v1  ;;  %v602_v1 = vld [vmem:[#allocation7 + $0x30] sm:$0xff] }
 0x168   :  { %v218_v3 = vpop.f32.mrb[3].mxu0 }
 0x169   :  { %1467 = vmatmul.mubr.f32.vlgmr.msra.gmra.mrb[0].mxu1 %v218_v3 }
 0x16a   :  { %1469 = vmatprep.mubr.f32.mxu1 %v1384_v0  ;;  %v1758_v0 = vpack.c.bf16 %v601_v63, %v600_v62 }
 0x16d   :  { %v1388_v4 = vpop.f32.mrb[4].mxu0  ;;  %1470 = vmatmul.mubr.f32.gmra.mrb[2].mxu1 %v1385_v2  ;;  %v603_v2 = vld [vmem:[#allocation7 + $0x38] sm:$0xff] }
 0x16e   :  { %v231_v5 = vpop.f32.mrb[5].mxu0  ;;  %v1762_v3 = vpack.c.bf16 %v603_v2, %v602_v1 }
 0x16f   :  { %v1389_v6 = vpop.f32.mrb[6].mxu0  ;;  %1472 = vmatprep.mubr.f32.mxu1 %v231_v5  ;;  %v605_v5 = vld [vmem:[#allocation7 + $0x48] sm:$0xff] }
 0x170   :  { %v234_v7 = vpop.f32.mrb[7].mxu0 }
 0x171   :  { %1473 = vmatmul.mubr.f32.gmra.mrb[4].mxu1 %v234_v7  ;;  %v606_v7 = vld [vmem:[#allocation7 + $0x50] sm:$0xff] }
 0x172   :  { %1475 = vmatprep.mubr.f32.mxu1 %v1388_v4  ;;  %v604_v4 = vld [vmem:[#allocation7 + $0x40] sm:$0xff] }
 0x175   :  { %1476 = vmatmul.mubr.f32.gmra.mrb[6].mxu1 %v1389_v6  ;;  %v1766_v6 = vpack.c.bf16 %v605_v5, %v604_v4 }
 0x176   :  { %1590 = vmatprep.mubr.msk.bf16.mxu1 %vm168_vm0, %v2277_v8 }
 0x185   :  { %v1424_v9 = vpop.f32.mrb[8].mxu0 }
 0x186   :  { %v344_v10 = vpop.f32.mrb[9].mxu0 }
 0x189   :  { %v1427_v11 = vpop.f32.mrb[10].mxu0 }
 0x18a   :  { %v354_v12 = vpop.f32.mrb[11].mxu0 }
 0x18d   :  { %v1430_v13 = vpop.f32.mrb[12].mxu0 }
 0x18e   :  { %v364_v14 = vpop.f32.mrb[13].mxu0 }
 0x191   :  { %v1433_v15 = vpop.f32.mrb[14].mxu0 }
 0x192   :  { %v374_v16 = vpop.f32.mrb[15].mxu0 }
 0x23c   :  { %v1468_v17 = vpop.f32.mrb[0].mxu1 }
 0x23d   :  { %v455_v19 = vadd.f32 %v1468_v17, %v1424_v9  ;;  %v449_v20 = vpop.f32.mrb[1].mxu1  ;;  %v607_v9 = vld [vmem:[#allocation7 + $0x58] sm:$0xff]  ;;  %v580_v17 = vld [vmem:[#allocation6] sm:$0xff] }
 0x23e   :  { %v450_v21 = vadd.f32 %v449_v20, %v344_v10  ;;  %v1770_v10 = vpack.c.bf16 %v607_v9, %v606_v7  ;;  %v582_v20 = vld [vmem:[#allocation6 + $0x10] sm:$0xff] }
 0x23f   :  { %v2415_v22 = vadd.f32 %v1195_v18, %v455_v19 }
 0x240   :  { %v495_v23 = vadd.f32 %v1195_v18, %v450_v21  ;;  %v1471_v24 = vpop.f32.mrb[2].mxu1  ;;  %v583_v21 = vld [vmem:[#allocation6 + $0x18] sm:$0xff] }
 0x241   :  { %v504_v25 = vmax.f32 %v2415_v22, 0.0  ;;  %v465_v8 = vadd.f32 %v1471_v24, %v1427_v11  ;;  %v459_v26 = vpop.f32.mrb[3].mxu1  ;;  %v608_v11 = vld [vmem:[#allocation7 + $0x60] sm:$0xff]  ;;  %v589_v22 = vld [vmem:[#allocation6 + $0x48] sm:$0xff] }
 0x242   :  { %v503_v27 = vmax.f32 %v495_v23, 0.0  ;;  %v460_v28 = vadd.f32 %v459_v26, %v354_v12  ;;  %v609_v12 = vld [vmem:[#allocation7 + $0x68] sm:$0xff]  ;;  %v1786_v23 = vpack.c.bf16 %v583_v21, %v582_v20  ;;  %v584_v24 = vld [vmem:[#allocation6 + $0x20] sm:$0xff]  ;;  %v933_v21 = vld [vmem:[%s2606_s9 + $0x18] sm:$0xff] }
 0x243   :  { %v2418_v31 = vadd.f32 %v1195_v18, %v465_v8  ;;  %v585_v8 = vld [vmem:[#allocation6 + $0x28] sm:$0xff] }
 0x244   :  { %v2420_v32 = vadd.f32 %v1195_v18, %v460_v28  ;;  %v1474_v33 = vpop.f32.mrb[4].mxu1  ;;  %v511_v34 = vpack.c.bf16 %v504_v25, %v503_v27  ;;  %v1790_v26 = vpack.c.bf16 %v585_v8, %v584_v24  ;;  %v587_v28 = vld [vmem:[#allocation6 + $0x38] sm:$0xff]  ;;  %v932_v20 = vld [vmem:[%s2606_s9 + $0x10] sm:$0xff]  ;;  %v935_v8 = vld [vmem:[%s2606_s9 + $0x28] sm:$0xff] }
 0x245   :  { %v506_v35 = vmax.f32 %v2418_v31, 0.0  ;;  %v475_v36 = vadd.f32 %v1474_v33, %v1430_v13  ;;  %v469_v37 = vpop.f32.mrb[5].mxu1  ;;  %v1774_v13 = vpack.c.bf16 %v609_v12, %v608_v11  ;;  %v591_v31 = vld [vmem:[#allocation6 + $0x58] sm:$0xff] }
 0x246   :  { %v505_v38 = vmax.f32 %v2420_v32, 0.0  ;;  %v470_v39 = vadd.f32 %v469_v37, %v364_v14  ;;  %1478 = vmatprep.subr.bf16.mxu0 %v511_v34  ;;  %v610_v14 = vld [vmem:[#allocation7 + $0x70] sm:$0xff]  ;;  %v593_v37 = vld [vmem:[#allocation6 + $0x68] sm:$0xff]  ;;  %v934_v24 = vld [vmem:[%s2606_s9 + $0x20] sm:$0xff] }
 0x247   :  { %v2426_v40 = vadd.f32 %v1195_v18, %v475_v36  ;;  %1479 = vmatpush3.bf16.msra.mxu0 %v511_v34  ;;  %v588_v34 = vld [vmem:[#allocation6 + $0x40] sm:$0xff]  ;;  %v590_v32 = vld [vmem:[#allocation6 + $0x50] sm:$0xff] }
 0x248   :  { %v2428_v41 = vadd.f32 %v1195_v18, %v470_v39  ;;  %v1477_v42 = vpop.f32.mrb[6].mxu1  ;;  %v512_v44 = vpack.c.bf16 %v506_v35, %v505_v38  ;;  %v592_v36 = vld [vmem:[#allocation6 + $0x60] sm:$0xff]  ;;  %v594_v39 = vld [vmem:[#allocation6 + $0x70] sm:$0xff] }
 0x249   :  { %v508_v45 = vmax.f32 %v2426_v40, 0.0  ;;  %v485_v46 = vadd.f32 %v1477_v42, %v1433_v15  ;;  %v479_v47 = vpop.f32.mrb[7].mxu1  ;;  %v611_v15 = vld [vmem:[#allocation7 + $0x78] sm:$0xff] }
 0x24a   :  { %v507_v48 = vmax.f32 %v2428_v41, 0.0  ;;  %v480_v49 = vadd.f32 %v479_v47, %v374_v16  ;;  %1480 = vmatprep.subr.bf16.mxu0 %v512_v44  ;;  %v1778_v16 = vpack.c.bf16 %v611_v15, %v610_v14  ;;  %v595_v40 = vld [vmem:[#allocation6 + $0x78] sm:$0xff] }
 0x24b   :  { %v2436_v50 = vadd.f32 %v1195_v18, %v485_v46  ;;  %1481 = vmatpush3.bf16.msra.mxu0 %v512_v44  ;;  %v1810_v41 = vpack.c.bf16 %v595_v40, %v594_v39  ;;  %v930_v15 = vld [vmem:[%s2606_s9] sm:$0xff]  ;;  %v915_v40 = vld [vmem:[#allocation10 + $0x8] sm:$0xff] }
 0x24c   :  { %v2438_v51 = vadd.f32 %v1195_v18, %v480_v49  ;;  %v513_v52 = vpack.c.bf16 %v508_v45, %v507_v48  ;;  %v581_v18 = vld [vmem:[#allocation6 + $0x8] sm:$0xff] }
 0x24d   :  { %v510_v53 = vmax.f32 %v2436_v50, 0.0  ;;  %v1782_v19 = vpack.c.bf16 %v581_v18, %v580_v17  ;;  %v914_v39 = vld [vmem:[#allocation10] sm:$0xff] }
 0x24e   :  { %v509_v56 = vmax.f32 %v2438_v51, 0.0  ;;  %1482 = vmatprep.subr.bf16.mxu0 %v513_v52  ;;  %v1200_v51 = vld [vmem:[#allocation9] ss:$0 sm:$0xff] }
 0x24f   :  { %1483 = vmatpush3.bf16.msra.mxu0 %v513_v52 }
 0x250   :  { %v514_v57 = vpack.c.bf16 %v510_v53, %v509_v56 }
 0x252   :  { %1484 = vmatprep.subr.bf16.mxu0 %v514_v57 }
 0x253   :  { %1485 = vmatpush3.bf16.msra.mxu0 %v514_v57 }
 0x254   :  { %1751 = vmatprep.subr.bf16.mxu0 %v1750_v58 }
 0x256   :  { %1487 = vmatmul.mubr.msk.bf16.vlgmr.msra.gmra.mrb[16].mxu0 %vm168_vm0, %v2331_v29 }
 0x257   :  { %1753 = vmatpush3.bf16.msra.mxu0 %v1750_v58  ;;  %1490 = vmatprep.mubr.msk.bf16.mxu0 %vm168_vm0, %v2333_v30 }
 0x258   :  { %1755 = vmatprep.subr.bf16.mxu0 %v1754_v61 }
 0x25b   :  { %1757 = vmatpush3.bf16.msra.mxu0 %v1754_v61 }
 0x25c   :  { %1759 = vmatprep.subr.bf16.mxu0 %v1758_v0 }
 0x25e   :  { %1491 = vmatmul.mubr.msk.bf16.gmra.mrb[20].mxu0 %vm168_vm0, %v2363_v43 }
 0x25f   :  { %1761 = vmatpush3.bf16.msra.mxu0 %v1758_v0  ;;  %1526 = vmatprep.mubr.f32.mxu0 %v503_v27  ;;  %v586_v27 = vld [vmem:[#allocation6 + $0x30] sm:$0xff] }
 0x260   :  { %1763 = vmatprep.subr.bf16.mxu0 %v1762_v3  ;;  %v1794_v33 = vpack.c.bf16 %v587_v28, %v586_v27  ;;  %v936_v27 = vld [vmem:[%s2606_s9 + $0x30] sm:$0xff]  ;;  %v937_v28 = vld [vmem:[%s2606_s9 + $0x38] sm:$0xff] }
 0x263   :  { %1765 = vmatpush3.bf16.msra.mxu0 %v1762_v3 }
 0x264   :  { %1767 = vmatprep.subr.bf16.mxu0 %v1766_v6 }
 0x267   :  { %1769 = vmatpush3.bf16.msra.mxu0 %v1766_v6 }
 0x268   :  { %1771 = vmatprep.subr.bf16.mxu0 %v1770_v10 }
 0x26b   :  { %1773 = vmatpush3.bf16.msra.mxu0 %v1770_v10 }
 0x26c   :  { %1775 = vmatprep.subr.bf16.mxu0 %v1774_v13 }
 0x26f   :  { %1777 = vmatpush3.bf16.msra.mxu0 %v1774_v13 }
 0x270   :  { %1779 = vmatprep.subr.bf16.mxu0 %v1778_v16 }
 0x273   :  { %1781 = vmatpush3.bf16.msra.mxu0 %v1778_v16  ;;  %v931_v16 = vld [vmem:[%s2606_s9 + $0x8] sm:$0xff] }
 0x274   :  { %1783 = vmatprep.subr.bf16.mxu0 %v1782_v19 }
 0x276   :  { %1527 = vmatmul.mubr.f32.vlgmr.msra.gmra.mrb[24].mxu0 %v504_v25  ;;  %v1798_v25 = vpack.c.bf16 %v589_v22, %v588_v34  ;;  %v940_v22 = vld [vmem:[%s2606_s9 + $0x50] sm:$0xff] }
 0x277   :  { %1529 = vmatprep.mubr.f32.mxu0 %v505_v38  ;;  %1785 = vmatpush3.bf16.msra.mxu0 %v1782_v19  ;;  %v1806_v38 = vpack.c.bf16 %v593_v37, %v592_v36  ;;  %v1814_v19 = vpack.c.bf16 %v931_v16, %v930_v15  ;;  %v944_v36 = vld [vmem:[%s2606_s9 + $0x70] sm:$0xff]  ;;  %v945_v37 = vld [vmem:[%s2606_s9 + $0x78] sm:$0xff] }
 0x278   :  { %1787 = vmatprep.subr.bf16.mxu0 %v1786_v23 }
 0x27a   :  { %1530 = vmatmul.mubr.f32.gmra.mrb[26].mxu0 %v506_v35  ;;  %v1802_v35 = vpack.c.bf16 %v591_v31, %v590_v32  ;;  %v942_v31 = vld [vmem:[%s2606_s9 + $0x60] sm:$0xff] }
 0x27b   :  { %1532 = vmatprep.mubr.f32.mxu0 %v507_v48  ;;  %1789 = vmatpush3.bf16.msra.mxu0 %v1786_v23  ;;  %v1818_v23 = vpack.c.bf16 %v933_v21, %v932_v20 }
 0x27c   :  { %1791 = vmatprep.subr.bf16.mxu0 %v1790_v26 }
 0x27e   :  { %1533 = vmatmul.mubr.f32.gmra.mrb[28].mxu0 %v508_v45 }
 0x27f   :  { %1535 = vmatprep.mubr.f32.mxu0 %v509_v56  ;;  %1793 = vmatpush3.bf16.msra.mxu0 %v1790_v26  ;;  %v1822_v26 = vpack.c.bf16 %v935_v8, %v934_v24 }
 0x280   :  { %1795 = vmatprep.subr.bf16.mxu0 %v1794_v33 }
 0x282   :  { %1536 = vmatmul.mubr.f32.gmra.mrb[30].mxu0 %v510_v53 }
 0x283   :  { %1797 = vmatpush3.bf16.msra.mxu0 %v1794_v33  ;;  %v1826_v33 = vpack.c.bf16 %v937_v28, %v936_v27 }
 0x284   :  { %1799 = vmatprep.subr.bf16.mxu0 %v1798_v25 }
 0x287   :  { %1801 = vmatpush3.bf16.msra.mxu0 %v1798_v25  ;;  %v941_v25 = vld [vmem:[%s2606_s9 + $0x58] sm:$0xff] }
 0x288   :  { %1803 = vmatprep.subr.bf16.mxu0 %v1802_v35  ;;  %v1834_v32 = vpack.c.bf16 %v941_v25, %v940_v22 }
 0x28b   :  { %1805 = vmatpush3.bf16.msra.mxu0 %v1802_v35 }
 0x28c   :  { %1807 = vmatprep.subr.bf16.mxu0 %v1806_v38 }
 0x28f   :  { %1809 = vmatpush3.bf16.msra.mxu0 %v1806_v38  ;;  %v1842_v38 = vpack.c.bf16 %v945_v37, %v944_v36 }
 0x290   :  { %1811 = vmatprep.subr.bf16.mxu0 %v1810_v41 }
 0x293   :  { %1813 = vmatpush3.bf16.msra.mxu0 %v1810_v41  ;;  %v1846_v41 = vpack.c.bf16 %v915_v40, %v914_v39 }
 0x329   :  { %v1488_v42 = vpop.f32.mrb[16].mxu0 }
 0x32a   :  { %v549_v44 = vpop.f32.mrb[17].mxu0 }
 0x32b   :  { %v1489_v45 = vpop.f32.mrb[18].mxu0  ;;  %1570 = vmatprep.mubr.f32.mxu0 %v549_v44  ;;  %v917_v44 = vld [vmem:[#allocation10 + $0x18] sm:$0xff] }
 0x32c   :  { %v552_v46 = vpop.f32.mrb[19].mxu0 }
 0x32d   :  { %1571 = vmatmul.mubr.f32.vlgmr.msra.gmra.mrb[24].mxu0 %v552_v46  ;;  %v918_v46 = vld [vmem:[#allocation10 + $0x20] sm:$0xff] }
 0x32e   :  { %1573 = vmatprep.mubr.f32.mxu0 %v1488_v42  ;;  %v916_v42 = vld [vmem:[#allocation10 + $0x10] sm:$0xff] }
 0x331   :  { %v1492_v47 = vpop.f32.mrb[20].mxu0  ;;  %1574 = vmatmul.mubr.f32.gmra.mrb[26].mxu0 %v1489_v45  ;;  %v1850_v45 = vpack.c.bf16 %v917_v44, %v916_v42 }
 0x332   :  { %v565_v48 = vpop.f32.mrb[21].mxu0 }
 0x333   :  { %v1493_v49 = vpop.f32.mrb[22].mxu0  ;;  %1576 = vmatprep.mubr.f32.mxu0 %v565_v48 }
 0x334   :  { %v568_v50 = vpop.f32.mrb[23].mxu0 }
 0x335   :  { %1577 = vmatmul.mubr.f32.gmra.mrb[28].mxu0 %v568_v50  ;;  %v921_v50 = vld [vmem:[#allocation10 + $0x38] sm:$0xff] }
 0x336   :  { %1579 = vmatprep.mubr.f32.mxu0 %v1492_v47  ;;  %v919_v47 = vld [vmem:[#allocation10 + $0x28] sm:$0xff] }
 0x337   :  { %v1854_v48 = vpack.c.bf16 %v919_v47, %v918_v46 }
 0x339   :  { %1580 = vmatmul.mubr.f32.gmra.mrb[30].mxu0 %v1493_v49  ;;  %v920_v49 = vld [vmem:[#allocation10 + $0x30] sm:$0xff] }
 0x400   :  { %v1572_v52 = vpop.f32.mrb[24].mxu0 }
 0x401   :  { %v2470_v53 = vadd.f32 %v1572_v52, %v1200_v51  ;;  %v783_v54 = vpop.f32.mrb[25].mxu0  ;;  %v922_v52 = vld [vmem:[#allocation10 + $0x40] sm:$0xff] }
 0x402   :  { %v829_v55 = vadd.f32 %v1200_v51, %v783_v54 }
 0x403   :  { %v838_v56 = vmax.f32 %v2470_v53, 0.0  ;;  %v923_v53 = vld [vmem:[#allocation10 + $0x48] sm:$0xff] }
 0x404   :  { %v837_v57 = vmax.f32 %v829_v55, 0.0  ;;  %v1575_v58 = vpop.f32.mrb[26].mxu0  ;;  %v1862_v54 = vpack.c.bf16 %v923_v53, %v922_v52  ;;  %v924_v55 = vld [vmem:[#allocation10 + $0x50] sm:$0xff] }
 0x405   :  { %v2473_v59 = vadd.f32 %v1575_v58, %v1200_v51  ;;  %v793_v60 = vpop.f32.mrb[27].mxu0  ;;  %v926_v58 = vld [vmem:[#allocation10 + $0x60] sm:$0xff] }
 0x406   :  { %v845_v61 = vpack.c.bf16 %v838_v56, %v837_v57  ;;  %v2477_v62 = vadd.f32 %v1200_v51, %v793_v60 }
 0x407   :  { %v840_v63 = vmax.f32 %v2473_v59, 0.0  ;;  %v927_v59 = vld [vmem:[#allocation10 + $0x68] sm:$0xff] }
 0x408   :  { %v839_v0 = vmax.f32 %v2477_v62, 0.0  ;;  %v1578_v1 = vpop.f32.mrb[28].mxu0  ;;  %1582 = vmatprep.subr.bf16.mxu1 %v845_v61  ;;  %v1870_v60 = vpack.c.bf16 %v927_v59, %v926_v58  ;;  %v929_v62 = vld [vmem:[#allocation10 + $0x78] sm:$0xff] }
 0x409   :  { %v2481_v2 = vadd.f32 %v1578_v1, %v1200_v51  ;;  %v803_v3 = vpop.f32.mrb[29].mxu0  ;;  %1583 = vmatpush3.bf16.msra.mxu1 %v845_v61  ;;  %v928_v61 = vld [vmem:[#allocation10 + $0x70] sm:$0xff] }
 0x40a   :  { %v846_v4 = vpack.c.bf16 %v840_v63, %v839_v0  ;;  %v2487_v5 = vadd.f32 %v1200_v51, %v803_v3 }
 0x40b   :  { %v842_v6 = vmax.f32 %v2481_v2, 0.0 }
 0x40c   :  { %v841_v7 = vmax.f32 %v2487_v5, 0.0  ;;  %v1581_v9 = vpop.f32.mrb[30].mxu0  ;;  %1584 = vmatprep.subr.bf16.mxu1 %v846_v4 }
 0x40d   :  { %v2491_v10 = vadd.f32 %v1581_v9, %v1200_v51  ;;  %v813_v11 = vpop.f32.mrb[31].mxu0  ;;  %1585 = vmatpush3.bf16.msra.mxu1 %v846_v4  ;;  %v1205_v9 = vld [vmem:[#allocation12] ss:$0 sm:$0xff] }
 0x40e   :  { %v847_v12 = vpack.c.bf16 %v842_v6, %v841_v7  ;;  %v2497_v13 = vadd.f32 %v1200_v51, %v813_v11  ;;  %v1858_v51 = vpack.c.bf16 %v921_v50, %v920_v49 }
 0x40f   :  { %v844_v14 = vmax.f32 %v2491_v10, 0.0 }
 0x410   :  { %v843_v17 = vmax.f32 %v2497_v13, 0.0  ;;  %1586 = vmatprep.subr.bf16.mxu1 %v847_v12 }
 0x411   :  { %1587 = vmatpush3.bf16.msra.mxu1 %v847_v12 }
 0x412   :  { %v848_v18 = vpack.c.bf16 %v844_v14, %v843_v17 }
 0x414   :  { %1588 = vmatprep.subr.bf16.mxu1 %v848_v18 }
 0x415   :  { %1589 = vmatpush3.bf16.msra.mxu1 %v848_v18 }
 0x416   :  { %1815 = vmatprep.subr.bf16.mxu1 %v1814_v19 }
 0x418   :  { %1591 = vmatmul.mubr.msk.bf16.vlgmr.msra.gmra.mrb[8].mxu1 %vm168_vm0, %v2331_v29  ;;  %v938_v29 = vld [vmem:[%s2606_s9 + $0x40] sm:$0xff] }
 0x419   :  { %1817 = vmatpush3.bf16.msra.mxu1 %v1814_v19  ;;  %1594 = vmatprep.mubr.msk.bf16.mxu1 %vm168_vm0, %v2333_v30  ;;  %v939_v30 = vld [vmem:[%s2606_s9 + $0x48] sm:$0xff] }
 0x41a   :  { %1819 = vmatprep.subr.bf16.mxu1 %v1818_v23  ;;  %v1830_v34 = vpack.c.bf16 %v939_v30, %v938_v29 }
 0x41d   :  { %1821 = vmatpush3.bf16.msra.mxu1 %v1818_v23 }
 0x41e   :  { %1823 = vmatprep.subr.bf16.mxu1 %v1822_v26 }
 0x420   :  { %1595 = vmatmul.mubr.msk.bf16.gmra.mrb[12].mxu1 %vm168_vm0, %v2363_v43  ;;  %v943_v43 = vld [vmem:[%s2606_s9 + $0x68] sm:$0xff] }
 0x421   :  { %1825 = vmatpush3.bf16.msra.mxu1 %v1822_v26  ;;  %1630 = vmatprep.mubr.f32.mxu1 %v837_v57  ;;  %v1838_v35 = vpack.c.bf16 %v943_v43, %v942_v31 }
 0x422   :  { %1827 = vmatprep.subr.bf16.mxu1 %v1826_v33 }
 0x425   :  { %1829 = vmatpush3.bf16.msra.mxu1 %v1826_v33 }
 0x426   :  { %1831 = vmatprep.subr.bf16.mxu1 %v1830_v34 }
 0x429   :  { %1833 = vmatpush3.bf16.msra.mxu1 %v1830_v34 }
 0x42a   :  { %1835 = vmatprep.subr.bf16.mxu1 %v1834_v32 }
 0x42d   :  { %1837 = vmatpush3.bf16.msra.mxu1 %v1834_v32 }
 0x42e   :  { %1839 = vmatprep.subr.bf16.mxu1 %v1838_v35 }
 0x431   :  { %1841 = vmatpush3.bf16.msra.mxu1 %v1838_v35 }
 0x432   :  { %1843 = vmatprep.subr.bf16.mxu1 %v1842_v38 }
 0x435   :  { %1845 = vmatpush3.bf16.msra.mxu1 %v1842_v38 }
 0x436   :  { %1847 = vmatprep.subr.bf16.mxu1 %v1846_v41 }
 0x438   :  { %1631 = vmatmul.mubr.f32.vlgmr.msra.gmra.mrb[16].mxu1 %v838_v56  ;;  %v925_v56 = vld [vmem:[#allocation10 + $0x58] sm:$0xff] }
 0x439   :  { %1633 = vmatprep.mubr.f32.mxu1 %v839_v0  ;;  %1849 = vmatpush3.bf16.msra.mxu1 %v1846_v41  ;;  %v1866_v57 = vpack.c.bf16 %v925_v56, %v924_v55 }
 0x43a   :  { %1851 = vmatprep.subr.bf16.mxu1 %v1850_v45 }
 0x43c   :  { %1634 = vmatmul.mubr.f32.gmra.mrb[18].mxu1 %v840_v63  ;;  %v1874_v63 = vpack.c.bf16 %v929_v62, %v928_v61 }
 0x43d   :  { %1636 = vmatprep.mubr.f32.mxu1 %v841_v7  ;;  %1853 = vmatpush3.bf16.msra.mxu1 %v1850_v45 }
 0x43e   :  { %1855 = vmatprep.subr.bf16.mxu1 %v1854_v48 }
 0x440   :  { %1637 = vmatmul.mubr.f32.gmra.mrb[20].mxu1 %v842_v6 }
 0x441   :  { %1639 = vmatprep.mubr.f32.mxu1 %v843_v17  ;;  %1857 = vmatpush3.bf16.msra.mxu1 %v1854_v48 }
 0x442   :  { %1859 = vmatprep.subr.bf16.mxu1 %v1858_v51 }
 0x444   :  { %1640 = vmatmul.mubr.f32.gmra.mrb[22].mxu1 %v844_v14 }
 0x445   :  { %1861 = vmatpush3.bf16.msra.mxu1 %v1858_v51 }
 0x446   :  { %1863 = vmatprep.subr.bf16.mxu1 %v1862_v54 }
 0x449   :  { %1865 = vmatpush3.bf16.msra.mxu1 %v1862_v54 }
 0x44a   :  { %1867 = vmatprep.subr.bf16.mxu1 %v1866_v57 }
 0x44d   :  { %1869 = vmatpush3.bf16.msra.mxu1 %v1866_v57 }
 0x44e   :  { %1871 = vmatprep.subr.bf16.mxu1 %v1870_v60 }
 0x451   :  { %1873 = vmatpush3.bf16.msra.mxu1 %v1870_v60 }
 0x452   :  { %1875 = vmatprep.subr.bf16.mxu1 %v1874_v63 }
 0x455   :  { %1877 = vmatpush3.bf16.msra.mxu1 %v1874_v63 }
 0x4eb   :  { %v1592_v0 = vpop.f32.mrb[8].mxu1 }
 0x4ec   :  { %v883_v1 = vpop.f32.mrb[9].mxu1 }
 0x4ed   :  { %v1593_v2 = vpop.f32.mrb[10].mxu1  ;;  %1674 = vmatprep.mubr.f32.mxu1 %v883_v1 }
 0x4ee   :  { %v886_v3 = vpop.f32.mrb[11].mxu1 }
 0x4ef   :  { %1675 = vmatmul.mubr.f32.vlgmr.msra.gmra.mrb[16].mxu1 %v886_v3 }
 0x4f0   :  { %1677 = vmatprep.mubr.f32.mxu1 %v1592_v0 }
 0x4f3   :  { %v1596_v4 = vpop.f32.mrb[12].mxu1  ;;  %1678 = vmatmul.mubr.f32.gmra.mrb[18].mxu1 %v1593_v2 }
 0x4f4   :  { %v899_v5 = vpop.f32.mrb[13].mxu1 }
 0x4f5   :  { %v1597_v6 = vpop.f32.mrb[14].mxu1  ;;  %1680 = vmatprep.mubr.f32.mxu1 %v899_v5 }
 0x4f6   :  { %v902_v7 = vpop.f32.mrb[15].mxu1 }
 0x4f7   :  { %1681 = vmatmul.mubr.f32.gmra.mrb[20].mxu1 %v902_v7 }
 0x4f8   :  { %1683 = vmatprep.mubr.f32.mxu1 %v1596_v4 }
 0x4fb   :  { %1684 = vmatmul.mubr.f32.gmra.mrb[22].mxu1 %v1597_v6 }
 0x5c2   :  { %v1676_v10 = vpop.f32.mrb[16].mxu1 }
 0x5c3   :  { %v1164_v11 = vadd.f32 %v1676_v10, %v1205_v9  ;;  %v1117_v12 = vpop.f32.mrb[17].mxu1 }
 0x5c4   :  { %v1163_v13 = vadd.f32 %v1205_v9, %v1117_v12 }
 0x5c5   :  { %1172 = vst [vmem:[%s2608_s11 + $0x8] sm:$0xff] %v1164_v11 }
 0x5c6   :  { %1171 = vst [vmem:[%s2608_s11] sm:$0xff] %v1163_v13  ;;  %v1679_v14 = vpop.f32.mrb[18].mxu1 }
 0x5c7   :  { %v1166_v15 = vadd.f32 %v1679_v14, %v1205_v9  ;;  %v1127_v16 = vpop.f32.mrb[19].mxu1 }
 0x5c8   :  { %v1165_v17 = vadd.f32 %v1205_v9, %v1127_v16 }
 0x5c9   :  { %1174 = vst [vmem:[%s2608_s11 + $0x18] sm:$0xff] %v1166_v15 }
 0x5ca   :  { %1173 = vst [vmem:[%s2608_s11 + $0x10] sm:$0xff] %v1165_v17  ;;  %v1682_v18 = vpop.f32.mrb[20].mxu1 }
 0x5cb   :  { %v1168_v19 = vadd.f32 %v1682_v18, %v1205_v9  ;;  %v1137_v20 = vpop.f32.mrb[21].mxu1 }
 0x5cc   :  { %v1167_v21 = vadd.f32 %v1205_v9, %v1137_v20 }
 0x5cd   :  { %1176 = vst [vmem:[%s2608_s11 + $0x28] sm:$0xff] %v1168_v19 }
 0x5ce   :  { %1175 = vst [vmem:[%s2608_s11 + $0x20] sm:$0xff] %v1167_v21  ;;  %v1685_v23 = vpop.f32.mrb[22].mxu1 }
 0x5cf   :  { %v1170_v24 = vadd.f32 %v1685_v23, %v1205_v9  ;;  %v1147_v8 = vpop.f32.mrb[23].mxu1 }
 0x5d0   :  { %v1169_v26 = vadd.f32 %v1205_v9, %v1147_v8 }
 0x5d1   :  { %1178 = vst [vmem:[%s2608_s11 + $0x38] sm:$0xff] %v1170_v24 }
 0x5d2   :  { %1177 = vst [vmem:[%s2608_s11 + $0x30] sm:$0xff] %v1169_v26 }
 0x5d3   :  { %1183 = vsyncpa [#allocation3], 1 }
 0x5d4   :  { %1184 = vsyncpa [#allocation5], 1 }
 0x5d5   :  { %1185 = vsyncpa [#allocation8], 1 }
 0x5d6   :  { %1186 = vsyncpa [#allocation11], 1 }

</bundles_post_ra>
